<compile_context>
chip_gen: v7x
topology: tpu7x:2x2x1
jax: 0.10.0
libtpu: 0.0.40
codegen_flags: <defaults>
</compile_context>

<pallas_src>
import jax
import jax.numpy as jnp
from jax.experimental import pallas as pl
from jax.experimental.pallas import tpu as pltpu


# -----------------------------------------------------------------------------
# Stage 1 kernel: H = [x | |A1@x| | |A2@x| | |A3@x|]           shape [N, 4C]
# grid = (row tiles, reduction tiles)   — reduction axis last, "arbitrary"
# -----------------------------------------------------------------------------
def _build_h_kernel(a123_ref, xk_ref, xj_ref, h_ref, acc_ref):
    # a123_ref: [3, tj, tk]   column block of the stacked A1..A3 row blocks
    # xk_ref:   [tk, C]       x rows matching this reduction slice (matmul RHS)
    # xj_ref:   [tj, C]       x rows matching this output row tile (H's slab 0)
    # h_ref:    [tj, 4C]      output
    # acc_ref:  [3*tj, C] f32 accumulator (|.| applied after full reduction)
    k = pl.program_id(1)

    @pl.when(k == 0)
    def _():
        acc_ref[...] = jnp.zeros_like(acc_ref)

    three_tj = acc_ref.shape[0]
    tk = a123_ref.shape[2]
    # Leading-dim merge (3, tj, tk) -> (3*tj, tk) is layout-free; one MXU call
    # streams all three operators against the same stationary RHS.
    a = a123_ref[...].reshape(three_tj, tk)
    acc_ref[...] += jnp.dot(a, xk_ref[...], preferred_element_type=jnp.float32)

    @pl.when(k == pl.num_programs(1) - 1)
    def _():
        tj = xj_ref.shape[0]
        habs = jnp.abs(acc_ref[...])
        parts = [xj_ref[...].astype(jnp.float32)] + [
            habs[i * tj:(i + 1) * tj] for i in range(3)
        ]
        # Single lane-dense (4C = 128-lane) store of the assembled tile.
        h_ref[...] = jnp.concatenate(parts, axis=-1).astype(h_ref.dtype)


# -----------------------------------------------------------------------------
# Stage 2 kernel: out = ELU(A0 @ H) @ Wfold + bias     (tiled matmul + epilogue)
# -----------------------------------------------------------------------------
def _fused_out_kernel(a0_ref, h_ref, w_ref, b_ref, o_ref, acc_ref):
    # a0_ref: [ti, tk]   h_ref: [tk, 4C]   w_ref: [4C, Fp]   b_ref: [1, Fp]
    # o_ref:  [ti, Fp]   acc_ref (scratch): [ti, 4C] f32
    k = pl.program_id(1)

    @pl.when(k == 0)
    def _():
        acc_ref[...] = jnp.zeros_like(acc_ref)

    acc_ref[...] += jnp.dot(a0_ref[...], h_ref[...],
                            preferred_element_type=jnp.float32)

    @pl.when(k == pl.num_programs(1) - 1)
    def _():
        y = acc_ref[...]
        z = jnp.where(y > 0, y, jnp.expm1(y))            # ELU, alpha = 1
        o_ref[...] = (
            jnp.dot(z, w_ref[...], preferred_element_type=jnp.float32) + b_ref[...]
        ).astype(o_ref.dtype)


# -----------------------------------------------------------------------------
# Host-side glue
# -----------------------------------------------------------------------------
def _build_dense_scatter_op(edge_index, edge_attr, num_nodes):
    """A[dst, src] += attr, so solo_pass(edge_index, x, attr) == A @ x."""
    src = edge_index[0]
    dst = edge_index[1]
    A = jnp.zeros((num_nodes, num_nodes), jnp.float32)
    return A.at[dst, src].add(edge_attr.astype(jnp.float32))


def _pick_tile(n, cap):
    """Largest multiple-of-128 divisor of n that is <= cap; else n (untiled)."""
    if n <= cap:
        return n
    t = (cap // 128) * 128
    while t >= 128:
        if n % t == 0:
            return t
        t -= 128
    return n


def scatter_forward(x, scatter_edge_index, scatter_edge_attr, edge_index_o, params,
                    *, compute_dtype=jnp.float32):
    """Pallas-backed forward of Scatter (if_gat=False, eval mode).

    x:                  [N, C] float32 node features
    scatter_edge_index: list of 4 int32 arrays [2, E_k]
    scatter_edge_attr:  list of 4 float32 arrays [E_k]
    edge_index_o:       unused in the non-GAT branch (kept for signature parity)
    params:             dict with 'W' [4,C,F], 'b' [4,1,F], 'scale' [4,1,F], 'shift' [4,1,F]
    compute_dtype:      dtype for A / x / H matmul operands (f32 default; bf16 halves
                        the A footprint and uses the MXU fast path, acc stays f32)
    """
    del edge_index_o
    N, C = x.shape
    F = params["W"].shape[-1]

    # --- dense scatter operators (glue; see TODO(synk) about the sparse path) ---
    Adense = [
        _build_dense_scatter_op(scatter_edge_index[k], scatter_edge_attr[k], N)
        for k in range(4)
    ]
    A0 = Adense[0].astype(compute_dtype)
    A123 = jnp.stack(Adense[1:4], axis=0).astype(compute_dtype)
    xc = x.astype(compute_dtype)

    # --- fold BN (eval) into the Linear weights, combine biases, pad to lanes ---
    W = params["W"].astype(jnp.float32)          # [4, C, F]
    b = params["b"].astype(jnp.float32)          # [4, 1, F]
    scale = params["scale"].astype(jnp.float32)  # [4, 1, F]
    shift = params["shift"].astype(jnp.float32)  # [4, 1, F]
    Wfold = (W * scale).reshape(4 * C, F)                    # [4C, F]
    bias = jnp.sum(b * scale + shift, axis=0)                # [1, F]
    Fp = ((F + 127) // 128) * 128                            # lane-dense output width
    if Fp != F:
        Wfold = jnp.pad(Wfold, ((0, 0), (0, Fp - F)))
        bias = jnp.pad(bias, ((0, 0), (0, Fp - F)))

    cparams = pltpu.CompilerParams(
        dimension_semantics=("parallel", "arbitrary"),
        vmem_limit_bytes=64 * 1024 * 1024,
    )

    # --- stage 1: H = [x | |A1@x| | |A2@x| | |A3@x|] -------------------------
    tj = _pick_tile(N, 256)
    tk1 = _pick_tile(N, 512)
    H = pl.pallas_call(
        _build_h_kernel,
        out_shape=jax.ShapeDtypeStruct((N, 4 * C), compute_dtype),
        grid_spec=pltpu.PrefetchScalarGridSpec(
            num_scalar_prefetch=0,
            grid=(N // tj, N // tk1),
            in_specs=[
                pl.BlockSpec((3, tj, tk1), lambda j, k: (0, j, k)),   # A1..A3 blocks
                pl.BlockSpec((tk1, C), lambda j, k: (k, 0)),          # x (matmul RHS)
                pl.BlockSpec((tj, C), lambda j, k: (j, 0)),           # x row block
            ],
            out_specs=pl.BlockSpec((tj, 4 * C), lambda j, k: (j, 0)),
            scratch_shapes=[pltpu.VMEM((3 * tj, C), jnp.float32)],
        ),
        compiler_params=cparams,
    )(A123, xc, xc)

    # --- stage 2: out = ELU(A0 @ H) @ Wfold + bias ----------------------------
    ti = _pick_tile(N, 256)
    tk = _pick_tile(N, 512)
    out_p = pl.pallas_call(
        _fused_out_kernel,
        out_shape=jax.ShapeDtypeStruct((N, Fp), jnp.float32),
        grid_spec=pltpu.PrefetchScalarGridSpec(
            num_scalar_prefetch=0,
            grid=(N // ti, N // tk),
            in_specs=[
                pl.BlockSpec((ti, tk), lambda i, k: (i, k)),          # A0
                pl.BlockSpec((tk, 4 * C), lambda i, k: (k, 0)),       # H
                pl.BlockSpec((4 * C, Fp), lambda i, k: (0, 0)),       # Wfold (resident)
                pl.BlockSpec((1, Fp), lambda i, k: (0, 0)),           # bias (resident)
            ],
            out_specs=pl.BlockSpec((ti, Fp), lambda i, k: (i, 0)),
            scratch_shapes=[pltpu.VMEM((ti, 4 * C), jnp.float32)],
        ),
        compiler_params=cparams,
    )(A0, H, Wfold, bias)

    return out_p[:, :F]


def _reference_forward(x, A, params):
    """Pure-JAX (unfused) reference for correctness checking."""
    y0 = A[0] @ x
    hs = [jnp.abs(A[k] @ x) for k in (1, 2, 3)]
    ys = [y0] + [A[0] @ h for h in hs]

    def branch(k, y):
        z = jnp.where(y > 0, y, jnp.expm1(y))
        z = z @ params["W"][k] + params["b"][k]
        return z * params["scale"][k] + params["shift"][k]

    return sum(branch(k, ys[k]) for k in range(4))


if __name__ == "__main__":
    key = jax.random.PRNGKey(0)
    N, C, F, E = 64, 32, 32, 256  # nodes, in_channels, out_channels, edges per scatter graph

    keys = jax.random.split(key, 16)
    x = jax.random.normal(keys[0], (N, C), jnp.float32)

    scatter_edge_index = []
    scatter_edge_attr = []
    for k in range(4):
        src = jax.random.randint(keys[1 + k], (E,), 0, N, jnp.int32)
        dst = jax.random.randint(keys[5 + k], (E,), 0, N, jnp.int32)
        attr = jax.random.normal(keys[9 + k], (E,), jnp.float32)
        scatter_edge_index.append(jnp.stack([src, dst], axis=0))
        scatter_edge_attr.append(attr)

    # unused (non-GAT branch), kept for signature parity with the PyTorch module
    edge_index_o = jnp.stack(
        [jax.random.randint(keys[13], (E,), 0, N, jnp.int32),
         jax.random.randint(keys[14], (E,), 0, N, jnp.int32)], axis=0)

    # Deterministic synthetic parameters (Linear + BatchNorm1d eval), num_gat = 4.
    pkey = jax.random.split(keys[15], 6)
    W = jax.random.normal(pkey[0], (4, C, F), jnp.float32) * 0.1
    b = jax.random.normal(pkey[1], (4, 1, F), jnp.float32) * 0.1
    gamma = 1.0 + 0.1 * jax.random.normal(pkey[2], (4, 1, F), jnp.float32)
    beta = 0.1 * jax.random.normal(pkey[3], (4, 1, F), jnp.float32)
    running_mean = 0.1 * jax.random.normal(pkey[4], (4, 1, F), jnp.float32)
    running_var = jnp.abs(1.0 + 0.1 * jax.random.normal(pkey[5], (4, 1, F), jnp.float32))
    eps = 1e-5
    scale = gamma / jnp.sqrt(running_var + eps)
    shift = beta - running_mean * scale
    params = {"W": W, "b": b, "scale": scale, "shift": shift}

    out = scatter_forward(x, scatter_edge_index, scatter_edge_attr, edge_index_o, params)
    out = jax.block_until_ready(out)

    # Self-check against the pure-JAX (unfused) reference.
    A = jnp.stack(
        [_build_dense_scatter_op(scatter_edge_index[k], scatter_edge_attr[k], N)
         for k in range(4)],
        axis=0,
    )
    ref = _reference_forward(x, A, params)
    assert out.shape == (N, F)
    assert jnp.allclose(out, ref, atol=1e-3, rtol=1e-3), "mismatch vs reference"

    print("KERNEL_OK")
</pallas_src>

<mosaic_0001>
module attributes {stable_mosaic.version = 11 : i64} {
  func.func @_build_h_kernel(%arg0: i32, %arg1: i32, %arg2: memref<3x64x64xf32, #tpu.memory_space<vmem>>, %arg3: memref<64x32xf32, #tpu.memory_space<vmem>>, %arg4: memref<64x32xf32, #tpu.memory_space<vmem>>, %arg5: memref<64x128xf32, #tpu.memory_space<vmem>>, %arg6: memref<192x32xf32, #tpu.memory_space<vmem>>) attributes {dimension_semantics = [#tpu.dimension_semantics<parallel>, #tpu.dimension_semantics<arbitrary>], iteration_bounds = array<i64: 1, 1>, scalar_prefetch = 0 : i64, scratch_operands = 1 : i64, tpu.core_type = #tpu.core_type<tc>, window_params = [{transform_indices = @transform_0, window_bounds = array<i64: 3, 64, 64>}, {transform_indices = @transform_1, window_bounds = array<i64: 64, 32>}, {transform_indices = @transform_2, window_bounds = array<i64: 64, 32>}, {transform_indices = @transform_3, window_bounds = array<i64: 64, 128>}]} {
    %c0_i32 = arith.constant 0 : i32
    %0 = arith.cmpi eq, %arg1, %c0_i32 : i32
    %1 = arith.extui %0 : i1 to i32
    %c0_i32_0 = arith.constant 0 : i32
    %2 = arith.cmpi ne, %1, %c0_i32_0 : i32
    scf.if %2 {
      %cst_11 = arith.constant 0.000000e+00 : f32
      %13 = vector.broadcast %cst_11 : f32 to vector<192x32xf32>
      %c0_12 = arith.constant 0 : index
      %c0_13 = arith.constant 0 : index
      %14 = vector.load %arg6[%c0_12, %c0_13] : memref<192x32xf32, #tpu.memory_space<vmem>>, vector<192x32xf32>
      tpu.vector_store %arg6[%c0_12, %c0_13], %13 {strides = array<i32>} : memref<192x32xf32, #tpu.memory_space<vmem>>, vector<192x32xf32>,
    } else {
    }
    %c0 = arith.constant 0 : index
    %c0_1 = arith.constant 0 : index
    %c0_2 = arith.constant 0 : index
    %3 = vector.load %arg2[%c0, %c0_1, %c0_2] : memref<3x64x64xf32, #tpu.memory_space<vmem>>, vector<3x64x64xf32>
    %4 = vector.shape_cast %3 : vector<3x64x64xf32> to vector<192x64xf32>
    %c0_3 = arith.constant 0 : index
    %c0_4 = arith.constant 0 : index
    %5 = vector.load %arg6[%c0_3, %c0_4] : memref<192x32xf32, #tpu.memory_space<vmem>>, vector<192x32xf32>
    %c0_5 = arith.constant 0 : index
    %c0_6 = arith.constant 0 : index
    %6 = vector.load %arg3[%c0_5, %c0_6] : memref<64x32xf32, #tpu.memory_space<vmem>>, vector<64x32xf32>
    %cst = arith.constant dense<0.000000e+00> : vector<192x32xf32>
    %7 = tpu.matmul %4, %6, %cst {dimension_numbers = #tpu.dot_dimension_numbers<[1], [0], [0], [1], [0, 0, 1, 1], [], []>} : vector<192x64xf32>, vector<64x32xf32>, vector<192x32xf32> -> vector<192x32xf32>
    %8 = arith.addf %5, %7 : vector<192x32xf32>
    %c0_7 = arith.constant 0 : index
    %c0_8 = arith.constant 0 : index
    %9 = vector.load %arg6[%c0_7, %c0_8] : memref<192x32xf32, #tpu.memory_space<vmem>>, vector<192x32xf32>
    tpu.vector_store %arg6[%c0_7, %c0_8], %8 {strides = array<i32>} : memref<192x32xf32, #tpu.memory_space<vmem>>, vector<192x32xf32>,
    %c0_i32_9 = arith.constant 0 : i32
    %10 = arith.cmpi eq, %arg1, %c0_i32_9 : i32
    %11 = arith.extui %10 : i1 to i32
    %c0_i32_10 = arith.constant 0 : i32
    %12 = arith.cmpi ne, %11, %c0_i32_10 : i32
    scf.if %12 {
      %c0_11 = arith.constant 0 : index
      %c0_12 = arith.constant 0 : index
      %13 = vector.load %arg6[%c0_11, %c0_12] : memref<192x32xf32, #tpu.memory_space<vmem>>, vector<192x32xf32>
      %14 = math.absf %13 : vector<192x32xf32>
      %c0_13 = arith.constant 0 : index
      %c0_14 = arith.constant 0 : index
      %15 = vector.load %arg4[%c0_13, %c0_14] : memref<64x32xf32, #tpu.memory_space<vmem>>, vector<64x32xf32>
      %16 = vector.extract_strided_slice %14 {offsets = [0, 0], sizes = [64, 32], strides = [1, 1]} : vector<192x32xf32> to vector<64x32xf32>
      %17 = vector.extract_strided_slice %14 {offsets = [64, 0], sizes = [64, 32], strides = [1, 1]} : vector<192x32xf32> to vector<64x32xf32>
      %18 = vector.extract_strided_slice %14 {offsets = [128, 0], sizes = [64, 32], strides = [1, 1]} : vector<192x32xf32> to vector<64x32xf32>
      %19 = tpu.concatenate %15, %16, %17, %18 in 1 : vector<64x32xf32>, vector<64x32xf32>, vector<64x32xf32>, vector<64x32xf32> -> vector<64x128xf32>
      %c0_15 = arith.constant 0 : index
      %c0_16 = arith.constant 0 : index
      %20 = vector.load %arg5[%c0_15, %c0_16] : memref<64x128xf32, #tpu.memory_space<vmem>>, vector<64x128xf32>
      tpu.vector_store %arg5[%c0_15, %c0_16], %19 {strides = array<i32>} : memref<64x128xf32, #tpu.memory_space<vmem>>, vector<64x128xf32>,
    } else {
    }
    return
  }
  func.func @transform_0(%arg0: i32, %arg1: i32) -> (i32, i32, i32) {
    %c0_i32 = arith.constant 0 : i32
    %c0_i32_0 = arith.constant 0 : i32
    return %c0_i32, %arg0, %arg1 : i32, i32, i32
  }
  func.func @transform_1(%arg0: i32, %arg1: i32) -> (i32, i32) {
    %c0_i32 = arith.constant 0 : i32
    %c0_i32_0 = arith.constant 0 : i32
    return %arg1, %c0_i32 : i32, i32
  }
  func.func @transform_2(%arg0: i32, %arg1: i32) -> (i32, i32) {
    %c0_i32 = arith.constant 0 : i32
    %c0_i32_0 = arith.constant 0 : i32
    return %arg0, %c0_i32 : i32, i32
  }
  func.func @transform_3(%arg0: i32, %arg1: i32) -> (i32, i32) {
    %c0_i32 = arith.constant 0 : i32
    %c0_i32_0 = arith.constant 0 : i32
    return %arg0, %c0_i32 : i32, i32
  }
}

</mosaic_0001>

<bundles_post_ra>
// kernel: tpu_custom_call.1
= control target key start
LH: loop header
LB: loop body
LE: loop exit
PB: predicated region body
PF: predicated region fallthrough
CT: control target
= control target key end

     0   :  { %8 = vsyncpa [#allocation4], 0  ;;  %s1107_s0 = inlined_call_operand.hbm [shape: f32[3,64,64], index: 0, kind: input, shape index: {}]   ;;  %s1108_s1 = inlined_call_operand.hbm [shape: f32[64,32], index: 1, kind: input, shape index: {}]   ;;  %s1109_s2 = inlined_call_operand.hbm [shape: f32[64,32], index: 2, kind: input, shape index: {}]   ;;  %s1110_s3 = inlined_call_operand.hbm [shape: f32[64,128], index: 3, kind: output, shape index: {}]  }
   0x1   :  { %9 = vsyncpa [#allocation7], 0 }
   0x2   :  { %10 = vsyncpa [#allocation5], 0  ;;  %s890_s12 = smov [#allocation6]   ;;  %s891_s14 = smov [#allocation3]  }
   0x3   :  { %s28_s13 = sshll.u32 %s890_s12, 4  ;;  %s16_s15 = sshll.u32 %s891_s14, 4  ;;  %s29_s13 = int_to_ptr.vmem [resolvable:$true] %s28_s13  ;;  %s920_s15 = int_to_ptr.vmem [resolvable:$true] %s16_s15 }
   0x4   :  { %s796_s18 = scalar_lea.hbm %s1108_s1, 1024 }
   0x5   :  { %p797_p0 = scmp.ne.s32.totalorder %s1108_s1, %s796_s18  ;;  %p800_p1 = scmp.lt.u32.totalorder %s796_s18, %s1108_s1 }
   0x7   :  { %p802_p2 = pnand %p800_p1, %p797_p0 }
   0x9   :  { %805 = shalt.err (!%p802_p2)
}
   0xa   :  { %s806_s23 = scalar_lea.vmem %s29_s13, 1024  ;;  %p811_p4 = scmp.lt.s32.totalorder %s29_s13, %s29_s13 }
   0xb   :  { %p807_p3 = scmp.ne.s32.totalorder %s29_s13, %s806_s23  ;;  %p812_p5 = scmp.lt.s32.totalorder %s806_s23, %s806_s23 }
   0xd   :  { %p813_p6 = por %p812_p5, %p811_p4 }
   0xf   :  { %p814_p7 = pnand %p813_p6, %p807_p3 }
  0x11   :  { %817 = shalt.err (!%p814_p7)
}
  0x12   :  { %s892_s24 = smov 128   ;;  %s893_s25 = smov 8  }
  0x13   :  { %34 = dma.hbm_to_vmem [thread:$0]  %s1108_s1, 1024, %s29_s13, [#allocation7], %s892_s24, %s892_s24, %s893_s25  }
  0x14   :  { %s818_s30 = scalar_lea.hbm %s1107_s0, 3072 }
  0x15   :  { %p819_p8 = scmp.ne.s32.totalorder %s1107_s0, %s818_s30  ;;  %p822_p9 = scmp.lt.u32.totalorder %s818_s30, %s1107_s0 }
  0x17   :  { %p824_p10 = pnand %p822_p9, %p819_p8 }
  0x19   :  { %827 = shalt.err (!%p824_p10)
}
  0x1a   :  { %s828_s8 = scalar_lea.vmem %s920_s15, 3072  ;;  %p833_p12 = scmp.lt.s32.totalorder %s920_s15, %s920_s15 }
  0x1b   :  { %p829_p11 = scmp.ne.s32.totalorder %s920_s15, %s828_s8  ;;  %p834_p13 = scmp.lt.s32.totalorder %s828_s8, %s828_s8 }
  0x1d   :  { %p835_p0 = por %p834_p13, %p833_p12 }
  0x1f   :  { %p836_p1 = pnand %p835_p0, %p829_p11 }
  0x21   :  { %839 = shalt.err (!%p836_p1)
}
  0x22   :  { %22 = dma.hbm_to_vmem [thread:$0]  %s1107_s0, 3072, %s920_s15, [#allocation4], %s892_s24, %s892_s24, %s893_s25  }
  0x23   :  { %s894_s10 = smov [#allocation8]   ;;  %s840_s14 = scalar_lea.hbm %s1109_s2, 1024 }
  0x24   :  { %s40_s11 = sshll.u32 %s894_s10, 4  ;;  %p841_p2 = scmp.ne.s32.totalorder %s1109_s2, %s840_s14  ;;  %s41_s11 = int_to_ptr.vmem [resolvable:$true] %s40_s11 }
  0x25   :  { %p844_p3 = scmp.lt.u32.totalorder %s840_s14, %s1109_s2 }
  0x27   :  { %p846_p4 = pnand %p844_p3, %p841_p2 }
  0x29   :  { %849 = shalt.err (!%p846_p4)
}
  0x2a   :  { %s850_s20 = scalar_lea.vmem %s41_s11, 1024  ;;  %p855_p6 = scmp.lt.s32.totalorder %s41_s11, %s41_s11 }
  0x2b   :  { %p851_p5 = scmp.ne.s32.totalorder %s41_s11, %s850_s20  ;;  %p856_p7 = scmp.lt.s32.totalorder %s850_s20, %s850_s20 }
  0x2d   :  { %p857_p8 = por %p856_p7, %p855_p6 }
  0x2f   :  { %p858_p9 = pnand %p857_p8, %p851_p5 }
  0x31   :  { %861 = shalt.err (!%p858_p9)
}
  0x32   :  { %46 = dma.hbm_to_vmem [thread:$0]  %s1109_s2, 1024, %s41_s11, [#allocation7], %s892_s24, %s892_s24, %s893_s25  }
  0x33   :  { %884 = dma.done.wait [#allocation4], 3072  }
  0x34   :  { %885 = vsyncadd [#allocation4], 4294964224 }
  0x35   :  { %886 = dma.done.wait [#allocation7], 2048  }
  0x36   :  { %887 = vsyncadd [#allocation7], 4294965248  ;;  %vm60_vm0 = vcmask 261120   ;;  %v895_v0 = vmov 0.0   ;;  %v133_v1 = vld [vmem:[#allocation6] sm:$0xff]  ;;  %v134_v2 = vld [vmem:[#allocation6 + $0x8] sm:$0xff] }
  0x37   :  { %62 = vst.msk [vmem:[#allocation2 + $0x8] sm:$0xff] %vm60_vm0, %v895_v0  ;;  %61 = vst.msk [vmem:[#allocation2] sm:$0xff] %vm60_vm0, %v895_v0  ;;  %v135_v3 = vld [vmem:[#allocation6 + $0x10] sm:$0xff]  ;;  %v762_v4 = vpack.c.bf16 %v134_v2, %v133_v1  ;;  %v136_v5 = vld [vmem:[#allocation6 + $0x18] sm:$0xff]  ;;  %vm141_vm1 = vcmask 523264   ;;  %s896_s2 = smov 64  }
  0x38   :  { %63 = vst.msk [vmem:[#allocation2 + $0x10] sm:$0xff] %vm60_vm0, %v895_v0  ;;  %64 = vst.msk [vmem:[#allocation2 + $0x18] sm:$0xff] %vm60_vm0, %v895_v0  ;;  %v766_v6 = vpack.c.bf16 %v136_v5, %v135_v3  ;;  %v137_v7 = vld [vmem:[#allocation6 + $0x20] sm:$0xff]  ;;  %v138_v8 = vld [vmem:[#allocation6 + $0x28] sm:$0xff]  ;;  %s897_s21 = smov 32   ;;  %s898_s22 = smov 96  }
  0x39   :  { %65 = vst.msk [vmem:[#allocation2 + $0x20] sm:$0xff] %vm60_vm0, %v895_v0  ;;  %66 = vst.msk [vmem:[#allocation2 + $0x28] sm:$0xff] %vm60_vm0, %v895_v0  ;;  %763 = vmatprep.subr.bf16.mxu0 %v762_v4  ;;  %778 = vmatprep.subr.bf16.mxu1 %v762_v4  ;;  %v85_v9 = vld [vmem:[#allocation3] sm:$0xff]  ;;  %v770_v11 = vpack.c.bf16 %v138_v8, %v137_v7  ;;  %v139_v12 = vld [vmem:[#allocation6 + $0x30] sm:$0xff]  ;;  %vm619_vm2 = vcmask 785408   ;;  %s899_s23 = smov [#allocation9]  }
  0x3a   :  { %67 = vst.msk [vmem:[#allocation2 + $0x30] sm:$0xff] %vm60_vm0, %v895_v0  ;;  %68 = vst.msk [vmem:[#allocation2 + $0x38] sm:$0xff] %vm60_vm0, %v895_v0  ;;  %v97_v10 = vld [vmem:[#allocation3 + $0x60] sm:$0xff]  ;;  %765 = vmatpush3.bf16.msra.mxu0 %v762_v4  ;;  %782 = vmatpush3.bf16.msra.mxu1 %v762_v4  ;;  %v140_v13 = vld [vmem:[#allocation6 + $0x38] sm:$0xff]  ;;  %s641_s26 = sshll.u32 %s899_s23, 4  ;;  %s642_s26 = int_to_ptr.vmem [resolvable:$true] %s641_s26 }
  0x3b   :  { %69 = vst.msk [vmem:[#allocation2 + $0x40] sm:$0xff] %vm60_vm0, %v895_v0  ;;  %70 = vst.msk [vmem:[#allocation2 + $0x48] sm:$0xff] %vm60_vm0, %v895_v0  ;;  %767 = vmatprep.subr.bf16.mxu0 %v766_v6  ;;  %779 = vmatprep.subr.bf16.mxu1 %v766_v6  ;;  %v774_v14 = vpack.c.bf16 %v140_v13, %v139_v12  ;;  %v86_v15 = vld [vmem:[#allocation3 + $0x8] sm:$0xff]  ;;  %v87_v17 = vld [vmem:[#allocation3 + $0x10] sm:$0xff]  ;;  %s862_s27 = scalar_lea.vmem %s642_s26, 1024  ;;  %p867_p11 = scmp.lt.s32.totalorder %s642_s26, %s642_s26 }
  0x3c   :  { %71 = vst.msk [vmem:[#allocation2 + $0x50] sm:$0xff] %vm60_vm0, %v895_v0  ;;  %72 = vst.msk [vmem:[#allocation2 + $0x58] sm:$0xff] %vm60_vm0, %v895_v0  ;;  %726 = vmatprep.mubr.msk.f32.mxu0 %vm141_vm1, %v85_v9  ;;  %744 = vmatprep.mubr.msk.f32.mxu1 %vm141_vm1, %v97_v10  ;;  %v98_v16 = vld [vmem:[#allocation3 + $0x68] sm:$0xff]  ;;  %v99_v18 = vld [vmem:[#allocation3 + $0x70] sm:$0xff]  ;;  %p863_p10 = scmp.ne.s32.totalorder %s642_s26, %s862_s27  ;;  %p868_p12 = scmp.lt.s32.totalorder %s862_s27, %s862_s27 }
  0x3d   :  { %73 = vst.msk [vmem:[#allocation2 + $0x60] sm:$0xff] %vm60_vm0, %v895_v0  ;;  %74 = vst.msk [vmem:[#allocation2 + $0x68] sm:$0xff] %vm60_vm0, %v895_v0  ;;  %v88_v19 = vld [vmem:[#allocation3 + $0x18] sm:$0xff]  ;;  %v89_v21 = vld [vmem:[#allocation3 + $0x20] sm:$0xff] }
  0x3e   :  { %75 = vst.msk [vmem:[#allocation2 + $0x70] sm:$0xff] %vm60_vm0, %v895_v0  ;;  %76 = vst.msk [vmem:[#allocation2 + $0x78] sm:$0xff] %vm60_vm0, %v895_v0  ;;  %769 = vmatpush3.bf16.msra.mxu0 %v766_v6  ;;  %783 = vmatpush3.bf16.msra.mxu1 %v766_v6  ;;  %v100_v20 = vld [vmem:[#allocation3 + $0x78] sm:$0xff]  ;;  %v101_v22 = vld [vmem:[#allocation3 + $0x80] sm:$0xff]  ;;  %p869_p13 = por %p868_p12, %p867_p11 }
  0x3f   :  { %77 = vst.msk [vmem:[#allocation2 + $0x80] sm:$0xff] %vm60_vm0, %v895_v0  ;;  %78 = vst.msk [vmem:[#allocation2 + $0x88] sm:$0xff] %vm60_vm0, %v895_v0  ;;  %771 = vmatprep.subr.bf16.mxu0 %v770_v11  ;;  %780 = vmatprep.subr.bf16.mxu1 %v770_v11  ;;  %v90_v23 = vld [vmem:[#allocation3 + $0x28] sm:$0xff]  ;;  %v91_v25 = vld [vmem:[#allocation3 + $0x30] sm:$0xff] }
  0x40   :  { %79 = vst.msk [vmem:[#allocation2 + $0x90] sm:$0xff] %vm60_vm0, %v895_v0  ;;  %80 = vst.msk [vmem:[#allocation2 + $0x98] sm:$0xff] %vm60_vm0, %v895_v0  ;;  %v102_v24 = vld [vmem:[#allocation3 + $0x88] sm:$0xff]  ;;  %v103_v26 = vld [vmem:[#allocation3 + $0x90] sm:$0xff]  ;;  %p870_p0 = pnand %p869_p13, %p863_p10 }
  0x41   :  { %81 = vst.msk [vmem:[#allocation2 + $0xa0] sm:$0xff] %vm60_vm0, %v895_v0  ;;  %82 = vst.msk [vmem:[#allocation2 + $0xa8] sm:$0xff] %vm60_vm0, %v895_v0  ;;  %v92_v27 = vld [vmem:[#allocation3 + $0x38] sm:$0xff]  ;;  %v93_v29 = vld [vmem:[#allocation3 + $0x40] sm:$0xff] }
  0x42   :  { %83 = vst.msk [vmem:[#allocation2 + $0xb0] sm:$0xff] %vm60_vm0, %v895_v0  ;;  %84 = vst.msk [vmem:[#allocation2 + $0xb8] sm:$0xff] %vm60_vm0, %v895_v0  ;;  %773 = vmatpush3.bf16.msra.mxu0 %v770_v11  ;;  %784 = vmatpush3.bf16.msra.mxu1 %v770_v11  ;;  %v104_v28 = vld [vmem:[#allocation3 + $0x98] sm:$0xff]  ;;  %v105_v30 = vld [vmem:[#allocation3 + $0xa0] sm:$0xff] }
  0x43   :  { %775 = vmatprep.subr.bf16.mxu0 %v774_v14  ;;  %781 = vmatprep.subr.bf16.mxu1 %v774_v14  ;;  %v94_v31 = vld [vmem:[#allocation3 + $0x48] sm:$0xff]  ;;  %v95_v33 = vld [vmem:[#allocation3 + $0x50] sm:$0xff]  ;;  %v96_v35 = vld [vmem:[#allocation3 + $0x58] sm:$0xff] }
  0x44   :  { %v106_v32 = vld [vmem:[#allocation3 + $0xa8] sm:$0xff]  ;;  %v107_v34 = vld [vmem:[#allocation3 + $0xb0] sm:$0xff]  ;;  %v108_v36 = vld [vmem:[#allocation3 + $0xb8] sm:$0xff] }
  0x45   :  { %v110_v37 = vld [vmem:[#allocation2 + $0x8] sm:$0xff]  ;;  %v109_v39 = vld [vmem:[#allocation2] sm:$0xff]  ;;  %v112_v49 = vld [vmem:[#allocation2 + $0x18] sm:$0xff] }
  0x46   :  { %777 = vmatpush3.bf16.msra.mxu0 %v774_v14  ;;  %785 = vmatpush3.bf16.msra.mxu1 %v774_v14  ;;  %v122_v38 = vld [vmem:[#allocation2 + $0x68] sm:$0xff]  ;;  %v121_v40 = vld [vmem:[#allocation2 + $0x60] sm:$0xff]  ;;  %v124_v50 = vld [vmem:[#allocation2 + $0x78] sm:$0xff] }
  0x47   :  { %v111_v51 = vld [vmem:[#allocation2 + $0x10] sm:$0xff]  ;;  %v114_v61 = vld [vmem:[#allocation2 + $0x28] sm:$0xff]  ;;  %v113_v63 = vld [vmem:[#allocation2 + $0x20] sm:$0xff] }
  0x48   :  { %v123_v52 = vld [vmem:[#allocation2 + $0x70] sm:$0xff]  ;;  %v126_v62 = vld [vmem:[#allocation2 + $0x88] sm:$0xff]  ;;  %v125_v0 = vld [vmem:[#allocation2 + $0x80] sm:$0xff] }
  0x49   :  { %727 = vmatmul.mubr.msk.f32.vlgmr.msra.gmra.mrb[0].mxu0 %vm141_vm1, %v86_v15  ;;  %745 = vmatmul.mubr.msk.f32.vlgmr.msra.gmra.mrb[0].mxu1 %vm141_vm1, %v98_v16  ;;  %v116_v7 = vld [vmem:[#allocation2 + $0x38] sm:$0xff]  ;;  %v115_v15 = vld [vmem:[#allocation2 + $0x30] sm:$0xff] }
  0x4a   :  { %729 = vmatprep.mubr.msk.f32.mxu0 %vm141_vm1, %v87_v17  ;;  %747 = vmatprep.mubr.msk.f32.mxu1 %vm141_vm1, %v99_v18  ;;  %v128_v12 = vld [vmem:[#allocation2 + $0x98] sm:$0xff]  ;;  %v127_v16 = vld [vmem:[#allocation2 + $0x90] sm:$0xff] }
  0x4d   :  { %730 = vmatmul.mubr.msk.f32.gmra.mrb[2].mxu0 %vm141_vm1, %v88_v19  ;;  %748 = vmatmul.mubr.msk.f32.gmra.mrb[2].mxu1 %vm141_vm1, %v100_v20 }
  0x4e   :  { %732 = vmatprep.mubr.msk.f32.mxu0 %vm141_vm1, %v89_v21  ;;  %750 = vmatprep.mubr.msk.f32.mxu1 %vm141_vm1, %v101_v22 }
  0x51   :  { %733 = vmatmul.mubr.msk.f32.gmra.mrb[4].mxu0 %vm141_vm1, %v90_v23  ;;  %751 = vmatmul.mubr.msk.f32.gmra.mrb[4].mxu1 %vm141_vm1, %v102_v24  ;;  %v118_v24 = vld [vmem:[#allocation2 + $0x48] sm:$0xff] }
  0x52   :  { %735 = vmatprep.mubr.msk.f32.mxu0 %vm141_vm1, %v91_v25  ;;  %753 = vmatprep.mubr.msk.f32.mxu1 %vm141_vm1, %v103_v26 }
  0x55   :  { %736 = vmatmul.mubr.msk.f32.gmra.mrb[6].mxu0 %vm141_vm1, %v92_v27  ;;  %754 = vmatmul.mubr.msk.f32.gmra.mrb[6].mxu1 %vm141_vm1, %v104_v28 }
  0x56   :  { %738 = vmatprep.mubr.msk.f32.mxu0 %vm141_vm1, %v93_v29  ;;  %756 = vmatprep.mubr.msk.f32.mxu1 %vm141_vm1, %v105_v30  ;;  %v130_v29 = vld [vmem:[#allocation2 + $0xa8] sm:$0xff] }
  0x59   :  { %739 = vmatmul.mubr.msk.f32.gmra.mrb[8].mxu0 %vm141_vm1, %v94_v31  ;;  %757 = vmatmul.mubr.msk.f32.gmra.mrb[8].mxu1 %vm141_vm1, %v106_v32  ;;  %v117_v32 = vld [vmem:[#allocation2 + $0x40] sm:$0xff] }
  0x5a   :  { %741 = vmatprep.mubr.msk.f32.mxu0 %vm141_vm1, %v95_v33  ;;  %759 = vmatprep.mubr.msk.f32.mxu1 %vm141_vm1, %v107_v34  ;;  %v129_v33 = vld [vmem:[#allocation2 + $0xa0] sm:$0xff] }
  0x5d   :  { %742 = vmatmul.mubr.msk.f32.gmra.mrb[10].mxu0 %vm141_vm1, %v96_v35  ;;  %760 = vmatmul.mubr.msk.f32.gmra.mrb[10].mxu1 %vm141_vm1, %v108_v36 }
 0x11c   :  { %v728_v41 = vpop.f32.mrb[0].mxu0  ;;  %v746_v42 = vpop.f32.mrb[0].mxu1 }
 0x11d   :  { %v400_v43 = vadd.f32 %v728_v41, %v110_v37  ;;  %v412_v44 = vadd.f32 %v746_v42, %v122_v38  ;;  %v280_v45 = vpop.f32.mrb[1].mxu0  ;;  %v340_v46 = vpop.f32.mrb[1].mxu1 }
 0x11e   :  { %v399_v47 = vadd.f32 %v280_v45, %v109_v39  ;;  %v411_v48 = vadd.f32 %v340_v46, %v121_v40  ;;  %v132_v45 = vld [vmem:[#allocation2 + $0xb8] sm:$0xff] }
 0x11f   :  { %425 = vst.msk [vmem:[#allocation2 + $0x8] sm:$0xff] %vm60_vm0, %v400_v43  ;;  %437 = vst.msk [vmem:[#allocation2 + $0x68] sm:$0xff] %vm60_vm0, %v412_v44  ;;  %v120_v44 = vld [vmem:[#allocation2 + $0x58] sm:$0xff] }
 0x120   :  { %424 = vst.msk [vmem:[#allocation2] sm:$0xff] %vm60_vm0, %v399_v47  ;;  %436 = vst.msk [vmem:[#allocation2 + $0x60] sm:$0xff] %vm60_vm0, %v411_v48  ;;  %v731_v53 = vpop.f32.mrb[2].mxu0  ;;  %v749_v54 = vpop.f32.mrb[2].mxu1  ;;  %v119_v47 = vld [vmem:[#allocation2 + $0x50] sm:$0xff] }
 0x121   :  { %v402_v55 = vadd.f32 %v731_v53, %v112_v49  ;;  %v290_v56 = vpop.f32.mrb[3].mxu0  ;;  %v414_v57 = vadd.f32 %v749_v54, %v124_v50  ;;  %v350_v58 = vpop.f32.mrb[3].mxu1  ;;  %v131_v48 = vld [vmem:[#allocation2 + $0xb0] sm:$0xff] }
 0x122   :  { %v401_v59 = vadd.f32 %v290_v56, %v111_v51  ;;  %v413_v60 = vadd.f32 %v350_v58, %v123_v52 }
 0x123   :  { %427 = vst.msk [vmem:[#allocation2 + $0x18] sm:$0xff] %vm60_vm0, %v402_v55  ;;  %439 = vst.msk [vmem:[#allocation2 + $0x78] sm:$0xff] %vm60_vm0, %v414_v57 }
 0x124   :  { %426 = vst.msk [vmem:[#allocation2 + $0x10] sm:$0xff] %vm60_vm0, %v401_v59  ;;  %438 = vst.msk [vmem:[#allocation2 + $0x70] sm:$0xff] %vm60_vm0, %v413_v60  ;;  %v734_v1 = vpop.f32.mrb[4].mxu0  ;;  %v752_v2 = vpop.f32.mrb[4].mxu1 }
 0x125   :  { %v404_v3 = vadd.f32 %v734_v1, %v114_v61  ;;  %v300_v4 = vpop.f32.mrb[5].mxu0  ;;  %v416_v5 = vadd.f32 %v752_v2, %v126_v62  ;;  %v360_v6 = vpop.f32.mrb[5].mxu1 }
 0x126   :  { %v464_v8 = vld [vmem:[#allocation2 + $0x68] sm:$0xff]  ;;  %v403_v10 = vadd.f32 %v300_v4, %v113_v63  ;;  %v415_v11 = vadd.f32 %v360_v6, %v125_v0 }
 0x127   :  { %v452_v9 = vld [vmem:[#allocation2 + $0x8] sm:$0xff]  ;;  %v488_v13 = vand.u32 2147483647, %v464_v8  ;;  %429 = vst.msk [vmem:[#allocation2 + $0x28] sm:$0xff] %vm60_vm0, %v404_v3  ;;  %441 = vst.msk [vmem:[#allocation2 + $0x88] sm:$0xff] %vm60_vm0, %v416_v5  ;;  %v451_v17 = vld [vmem:[#allocation2] sm:$0xff] }
 0x128   :  { %v476_v14 = vand.u32 2147483647, %v452_v9  ;;  %428 = vst.msk [vmem:[#allocation2 + $0x20] sm:$0xff] %vm60_vm0, %v403_v10  ;;  %440 = vst.msk [vmem:[#allocation2 + $0x80] sm:$0xff] %vm60_vm0, %v415_v11  ;;  %v737_v18 = vpop.f32.mrb[6].mxu0  ;;  %v755_v19 = vpop.f32.mrb[6].mxu1 }
 0x129   :  { %557 = vrot.lane.b32.xlu1 %v488_v13, %s896_s2  ;;  %v406_v20 = vadd.f32 %v737_v18, %v116_v7  ;;  %v310_v21 = vpop.f32.mrb[7].mxu0  ;;  %v418_v22 = vadd.f32 %v755_v19, %v128_v12  ;;  %v370_v23 = vpop.f32.mrb[7].mxu1  ;;  %v475_v31 = vand.u32 2147483647, %v451_v17  ;;  %v463_v34 = vld [vmem:[#allocation2 + $0x60] sm:$0xff] }
 0x12a   :  { %517 = vrot.lane.b32.xlu0 %v476_v14, %s897_s21  ;;  %v454_v25 = vld [vmem:[#allocation2 + $0x18] sm:$0xff]  ;;  %v405_v27 = vadd.f32 %v310_v21, %v115_v15  ;;  %v417_v28 = vadd.f32 %v370_v23, %v127_v16  ;;  %v487_v46 = vand.u32 2147483647, %v463_v34 }
 0x12b   :  { %v466_v26 = vld [vmem:[#allocation2 + $0x78] sm:$0xff]  ;;  %v478_v30 = vand.u32 2147483647, %v454_v25  ;;  %431 = vst.msk [vmem:[#allocation2 + $0x38] sm:$0xff] %vm60_vm0, %v406_v20  ;;  %443 = vst.msk [vmem:[#allocation2 + $0x98] sm:$0xff] %vm60_vm0, %v418_v22  ;;  %v453_v49 = vld [vmem:[#allocation2 + $0x10] sm:$0xff] }
 0x12c   :  { %430 = vst.msk [vmem:[#allocation2 + $0x30] sm:$0xff] %vm60_vm0, %v405_v27  ;;  %442 = vst.msk [vmem:[#allocation2 + $0x90] sm:$0xff] %vm60_vm0, %v417_v28  ;;  %v740_v35 = vpop.f32.mrb[8].mxu0  ;;  %v758_v36 = vpop.f32.mrb[8].mxu1  ;;  %v490_v37 = vand.u32 2147483647, %v466_v26 }
 0x12d   :  { %521 = vrot.lane.b32.xlu1 %v478_v30, %s897_s21  ;;  %v408_v38 = vadd.f32 %v740_v35, %v118_v24  ;;  %v320_v39 = vpop.f32.mrb[9].mxu0  ;;  %v420_v40 = vadd.f32 %v758_v36, %v130_v29  ;;  %v380_v41 = vpop.f32.mrb[9].mxu1  ;;  %v465_v50 = vld [vmem:[#allocation2 + $0x70] sm:$0xff]  ;;  %v477_v61 = vand.u32 2147483647, %v453_v49 }
 0x12e   :  { %515 = vrot.lane.b32.xlu0 %v475_v31, %s897_s21  ;;  %v407_v42 = vadd.f32 %v320_v39, %v117_v32  ;;  %v419_v43 = vadd.f32 %v380_v41, %v129_v33  ;;  %v456_v57 = vld [vmem:[#allocation2 + $0x28] sm:$0xff]  ;;  %v489_v62 = vand.u32 2147483647, %v465_v50 }
 0x12f   :  { %433 = vst.msk [vmem:[#allocation2 + $0x48] sm:$0xff] %vm60_vm0, %v408_v38  ;;  %445 = vst.msk [vmem:[#allocation2 + $0xa8] sm:$0xff] %vm60_vm0, %v420_v40  ;;  %v455_v58 = vld [vmem:[#allocation2 + $0x20] sm:$0xff]  ;;  %v480_v63 = vand.u32 2147483647, %v456_v57  ;;  %v468_v1 = vld [vmem:[#allocation2 + $0x88] sm:$0xff] }
 0x130   :  { %432 = vst.msk [vmem:[#allocation2 + $0x40] sm:$0xff] %vm60_vm0, %v407_v42  ;;  %444 = vst.msk [vmem:[#allocation2 + $0xa0] sm:$0xff] %vm60_vm0, %v419_v43  ;;  %v743_v51 = vpop.f32.mrb[10].mxu0  ;;  %v761_v52 = vpop.f32.mrb[10].mxu1  ;;  %v479_v0 = vand.u32 2147483647, %v455_v58 }
 0x131   :  { %561 = vrot.lane.b32.xlu1 %v490_v37, %s896_s2  ;;  %v410_v53 = vadd.f32 %v743_v51, %v120_v44  ;;  %v330_v54 = vpop.f32.mrb[11].mxu0  ;;  %v422_v55 = vadd.f32 %v761_v52, %v132_v45  ;;  %v390_v56 = vpop.f32.mrb[11].mxu1  ;;  %v467_v2 = vld [vmem:[#allocation2 + $0x80] sm:$0xff]  ;;  %v492_v3 = vand.u32 2147483647, %v468_v1  ;;  %v500_v45 = vld [vmem:[#allocation8 + $0x8] sm:$0xff] }
 0x132   :  { %555 = vrot.lane.b32.xlu0 %v487_v46, %s896_s2  ;;  %v409_v59 = vadd.f32 %v330_v54, %v119_v47  ;;  %v421_v60 = vadd.f32 %v390_v56, %v131_v48  ;;  %v491_v4 = vand.u32 2147483647, %v467_v2  ;;  %v458_v5 = vld [vmem:[#allocation2 + $0x38] sm:$0xff]  ;;  %v499_v46 = vld [vmem:[#allocation8] sm:$0xff]  ;;  %v504_v47 = vld [vmem:[#allocation8 + $0x28] sm:$0xff] }
 0x133   :  { %435 = vst.msk [vmem:[#allocation2 + $0x58] sm:$0xff] %vm60_vm0, %v410_v53  ;;  %447 = vst.msk [vmem:[#allocation2 + $0xb8] sm:$0xff] %vm60_vm0, %v422_v55  ;;  %v457_v6 = vld [vmem:[#allocation2 + $0x30] sm:$0xff]  ;;  %v482_v7 = vand.u32 2147483647, %v458_v5  ;;  %v470_v9 = vld [vmem:[#allocation2 + $0x98] sm:$0xff] }
 0x134   :  { %434 = vst.msk [vmem:[#allocation2 + $0x50] sm:$0xff] %vm60_vm0, %v409_v59  ;;  %446 = vst.msk [vmem:[#allocation2 + $0xb0] sm:$0xff] %vm60_vm0, %v421_v60  ;;  %v481_v8 = vand.u32 2147483647, %v457_v6  ;;  %v469_v10 = vld [vmem:[#allocation2 + $0x90] sm:$0xff]  ;;  %v503_v48 = vld [vmem:[#allocation8 + $0x20] sm:$0xff] }
 0x135   :  { %519 = vrot.lane.b32.xlu1 %v477_v61, %s897_s21  ;;  %v494_v11 = vand.u32 2147483647, %v470_v9  ;;  %v493_v12 = vand.u32 2147483647, %v469_v10 }
 0x136   :  { %559 = vrot.lane.b32.xlu0 %v489_v62, %s896_s2  ;;  %v460_v13 = vld [vmem:[#allocation2 + $0x48] sm:$0xff] }
 0x137   :  { %v459_v14 = vld [vmem:[#allocation2 + $0x40] sm:$0xff]  ;;  %v484_v15 = vand.u32 2147483647, %v460_v13  ;;  %v472_v17 = vld [vmem:[#allocation2 + $0xa8] sm:$0xff] }
 0x138   :  { %v483_v16 = vand.u32 2147483647, %v459_v14  ;;  %v471_v18 = vld [vmem:[#allocation2 + $0xa0] sm:$0xff]  ;;  %v496_v19 = vand.u32 2147483647, %v472_v17 }
 0x139   :  { %525 = vrot.lane.b32.xlu1 %v480_v63, %s897_s21  ;;  %v495_v20 = vand.u32 2147483647, %v471_v18  ;;  %v502_v63 = vld [vmem:[#allocation8 + $0x18] sm:$0xff] }
 0x13a   :  { %523 = vrot.lane.b32.xlu0 %v479_v0, %s897_s21  ;;  %v462_v21 = vld [vmem:[#allocation2 + $0x58] sm:$0xff]  ;;  %v501_v0 = vld [vmem:[#allocation8 + $0x10] sm:$0xff] }
 0x13b   :  { %v461_v22 = vld [vmem:[#allocation2 + $0x50] sm:$0xff]  ;;  %v486_v23 = vand.u32 2147483647, %v462_v21  ;;  %v474_v25 = vld [vmem:[#allocation2 + $0xb8] sm:$0xff] }
 0x13c   :  { %v485_v24 = vand.u32 2147483647, %v461_v22  ;;  %v473_v26 = vld [vmem:[#allocation2 + $0xb0] sm:$0xff]  ;;  %v498_v27 = vand.u32 2147483647, %v474_v25 }
 0x13d   :  { %581 = vrot.lane.b32.xlu1 %v492_v3, %s898_s22  ;;  %v497_v28 = vand.u32 2147483647, %v473_v26  ;;  %v506_v3 = vld [vmem:[#allocation8 + $0x38] sm:$0xff] }
 0x13e   :  { %579 = vrot.lane.b32.xlu0 %v491_v4, %s898_s22  ;;  %v505_v4 = vld [vmem:[#allocation8 + $0x30] sm:$0xff] }
 0x141   :  { %529 = vrot.lane.b32.xlu1 %v482_v7, %s897_s21 }
 0x142   :  { %527 = vrot.lane.b32.xlu0 %v481_v8, %s897_s21 }
 0x145   :  { %585 = vrot.lane.b32.xlu1 %v494_v11, %s898_s22 }
 0x146   :  { %583 = vrot.lane.b32.xlu0 %v493_v12, %s898_s22 }
 0x149   :  { %549 = vrot.lane.b32.xlu1 %v484_v15, %s896_s2 }
 0x14a   :  { %547 = vrot.lane.b32.xlu0 %v483_v16, %s896_s2 }
 0x14d   :  { %589 = vrot.lane.b32.xlu1 %v496_v19, %s898_s22 }
 0x14e   :  { %587 = vrot.lane.b32.xlu0 %v495_v20, %s898_s22 }
 0x151   :  { %553 = vrot.lane.b32.xlu1 %v486_v23, %s896_s2 }
 0x152   :  { %551 = vrot.lane.b32.xlu0 %v485_v24, %s896_s2 }
 0x155   :  { %593 = vrot.lane.b32.xlu1 %v498_v27, %s898_s22 }
 0x156   :  { %591 = vrot.lane.b32.xlu0 %v497_v28, %s898_s22 }
 0x19b   :  { %v558_v29 = vpop.permute.xlu1 %557 }
 0x19c   :  { %v518_v30 = vpop.permute.xlu0 %517 }
 0x19d   :  { %v604_v49 = vsel %vm60_vm0, %v500_v45, %v518_v30 }
 0x19f   :  { %v522_v31 = vpop.permute.xlu1 %521 }
 0x1a0   :  { %v516_v32 = vpop.permute.xlu0 %515  ;;  %v606_v5 = vsel %vm60_vm0, %v502_v63, %v522_v31 }
 0x1a1   :  { %v603_v50 = vsel %vm60_vm0, %v499_v46, %v516_v32 }
 0x1a3   :  { %v562_v33 = vpop.permute.xlu1 %561 }
 0x1a4   :  { %v556_v34 = vpop.permute.xlu0 %555 }
 0x1a7   :  { %v520_v35 = vpop.permute.xlu1 %519 }
 0x1a8   :  { %v560_v36 = vpop.permute.xlu0 %559  ;;  %v605_v6 = vsel %vm60_vm0, %v501_v0, %v520_v35 }
 0x1ab   :  { %v526_v37 = vpop.permute.xlu1 %525 }
 0x1ac   :  { %v524_v38 = vpop.permute.xlu0 %523  ;;  %v608_v53 = vsel %vm60_vm0, %v504_v47, %v526_v37 }
 0x1ad   :  { %v607_v54 = vsel %vm60_vm0, %v503_v48, %v524_v38  ;;  %v616_v59 = vsel %vm141_vm1, %v608_v53, %v558_v29 }
 0x1ae   :  { %v615_v61 = vsel %vm141_vm1, %v607_v54, %v556_v34 }
 0x1af   :  { %v582_v39 = vpop.permute.xlu1 %581 }
 0x1b0   :  { %v580_v40 = vpop.permute.xlu0 %579 }
 0x1b3   :  { %v530_v41 = vpop.permute.xlu1 %529 }
 0x1b4   :  { %v528_v42 = vpop.permute.xlu0 %527  ;;  %v610_v9 = vsel %vm60_vm0, %v506_v3, %v530_v41 }
 0x1b5   :  { %v609_v10 = vsel %vm60_vm0, %v505_v4, %v528_v42  ;;  %v618_v15 = vsel %vm141_vm1, %v610_v9, %v562_v33 }
 0x1b6   :  { %v617_v17 = vsel %vm141_vm1, %v609_v10, %v560_v36 }
 0x1b7   :  { %v586_v43 = vpop.permute.xlu1 %585 }
 0x1b8   :  { %v584_v44 = vpop.permute.xlu0 %583 }
 0x1bb   :  { %v550_v51 = vpop.permute.xlu1 %549 }
 0x1bc   :  { %v548_v52 = vpop.permute.xlu0 %547  ;;  %v612_v55 = vsel %vm141_vm1, %v604_v49, %v550_v51 }
 0x1bd   :  { %v611_v56 = vsel %vm141_vm1, %v603_v50, %v548_v52  ;;  %v621_v57 = vsel %vm619_vm2, %v612_v55, %v582_v39 }
 0x1be   :  { %v620_v58 = vsel %vm619_vm2, %v611_v56, %v580_v40  ;;  %629 = vst [vmem:[#allocation9 + $0x8] sm:$0xff] %v621_v57 }
 0x1bf   :  { %628 = vst [vmem:[#allocation9] sm:$0xff] %v620_v58  ;;  %v590_v60 = vpop.permute.xlu1 %589 }
 0x1c0   :  { %v588_v62 = vpop.permute.xlu0 %587  ;;  %v625_v1 = vsel %vm619_vm2, %v616_v59, %v590_v60 }
 0x1c1   :  { %v624_v2 = vsel %vm619_vm2, %v615_v61, %v588_v62  ;;  %633 = vst [vmem:[#allocation9 + $0x28] sm:$0xff] %v625_v1 }
 0x1c2   :  { %632 = vst [vmem:[#allocation9 + $0x20] sm:$0xff] %v624_v2 }
 0x1c3   :  { %v554_v7 = vpop.permute.xlu1 %553 }
 0x1c4   :  { %v552_v8 = vpop.permute.xlu0 %551  ;;  %v614_v11 = vsel %vm141_vm1, %v606_v5, %v554_v7 }
 0x1c5   :  { %v613_v12 = vsel %vm141_vm1, %v605_v6, %v552_v8  ;;  %v623_v13 = vsel %vm619_vm2, %v614_v11, %v586_v43 }
 0x1c6   :  { %v622_v14 = vsel %vm619_vm2, %v613_v12, %v584_v44  ;;  %631 = vst [vmem:[#allocation9 + $0x18] sm:$0xff] %v623_v13 }
 0x1c7   :  { %630 = vst [vmem:[#allocation9 + $0x10] sm:$0xff] %v622_v14  ;;  %v594_v16 = vpop.permute.xlu1 %593 }
 0x1c8   :  { %v592_v18 = vpop.permute.xlu0 %591  ;;  %v627_v19 = vsel %vm619_vm2, %v618_v15, %v594_v16 }
 0x1c9   :  { %v626_v20 = vsel %vm619_vm2, %v617_v17, %v592_v18  ;;  %635 = vst [vmem:[#allocation9 + $0x38] sm:$0xff] %v627_v19 }
 0x1ca   :  { %634 = vst [vmem:[#allocation9 + $0x30] sm:$0xff] %v626_v20 }
 0x1cb   :  { %873 = shalt.err (!%p870_p0)
}
 0x1cc   :  { %s874_s30 = scalar_lea.hbm %s1110_s3, 1024 }
 0x1cd   :  { %p875_p1 = scmp.ne.s32.totalorder %s1110_s3, %s874_s30  ;;  %p878_p2 = scmp.lt.u32.totalorder %s874_s30, %s1110_s3 }
 0x1cf   :  { %p880_p3 = pnand %p878_p2, %p875_p1 }
 0x1d1   :  { %883 = shalt.err (!%p880_p3)
}
 0x1d2   :  { %647 = dma.vmem_to_hbm [thread:$0]  %s642_s26, 1024, %s1110_s3, [#allocation5], %s892_s24, %s892_s24, %s893_s25  }
 0x1d3   :  { %888 = dma.done.wait [#allocation5], 1024  }
 0x1d4   :  { %889 = vsyncadd [#allocation5], 4294966272 }
 0x1d5   :  { %651 = vsyncpa [#allocation4], 1 }
 0x1d6   :  { %652 = vsyncpa [#allocation7], 1 }
 0x1d7   :  { %653 = vsyncpa [#allocation5], 1 }

</bundles_post_ra>
